<compile_context>
chip_gen: v6e
topology: v6e:2x2x1
jax: 0.10.0
libtpu: 0.0.40
codegen_flags: <defaults>
</compile_context>

<pallas_src>
import jax
import jax.numpy as jnp
from jax.experimental import pallas as pl
from jax.experimental.pallas import tpu as pltpu


def _round_up(x, m):
    return ((x + m - 1) // m) * m


def _make_odm_kernel(num_layers):
    """Kernel signature:
       (x_ref, [w_folded_i, shift_i] * num_layers, w_final, out_ref)
       x_ref:    (C_in, TN)    channel-on-sublane / points-on-lane activation tile
       w_folded: (C_out, C_in) conv 1x1 weight with BN scale folded in
       shift:    (C_out, 1)    folded BN shift
       w_final:  (C_final, C_last)
       out_ref:  (C_final, TN)
    """

    def kernel(*refs):
        x_ref = refs[0]
        out_ref = refs[-1]
        params = refs[1:-1]

        h = x_ref[...].astype(jnp.float32)                      # (C_in, TN)
        idx = 0
        for _ in range(num_layers):
            w = params[idx][...]                                 # (C_out, C_in)
            shift = params[idx + 1][...]                         # (C_out, 1)
            idx += 2
            h = jnp.dot(w, h, preferred_element_type=jnp.float32)  # MXU
            h = jnp.maximum(h + shift, 0.0)                        # folded BN + ReLU (VPU)
        w_final = params[idx][...]                               # (C_final, C_last)
        logits = jnp.dot(w_final, h, preferred_element_type=jnp.float32)
        out_ref[...] = jax.nn.sigmoid(logits).astype(out_ref.dtype)

    return kernel


def _const_spec(arr):
    """Full-extent BlockSpec with a constant index_map (stays VMEM-resident)."""
    zeros = (0,) * arr.ndim
    return pl.BlockSpec(arr.shape, lambda b, n, _z=zeros: _z)


def odm_head_forward(feat, layer_weights, bn_params, w_final, eps=1e-5, tn_target=32768):
    """feat: (B, C_in, N)  (PyTorch channel-first layout, trailing W dim already squeezed)
       layer_weights: list of (C_out, C_in) conv 1x1 weights
       bn_params: list of (gamma, beta, running_mean, running_var), each (C_out,)
       w_final: (C_final, C_last)
    Returns (B, C_final, N), matching OdmHead.forward (eval-mode BN).
    """
    B, C_in, N = feat.shape

    # --- tile size along the points axis (lane axis) ------------------------------
    # Big tiles amortize per-grid-step overhead; cap so that
    #   (a) a tile never exceeds the 128-aligned extent of N,
    #   (b) the grid keeps >= 4 steps when N allows it (2 TCs x double-buffer on v7x).
    min_n_tiles = max(1, -(-4 // max(B, 1)))                    # ceil(4 / B)
    tn_cap = _round_up(max(1, -(-N // min_n_tiles)), 128)       # ceil(N / min_n_tiles), x128
    TN = max(128, min(_round_up(tn_target, 128), _round_up(N, 128), tn_cap))

    # --- fold eval-mode BN into the conv weights / a per-channel shift -------------
    kernel_inputs = [feat]
    for w, (gamma, beta, mean, var) in zip(layer_weights, bn_params):
        scale = gamma / jnp.sqrt(var + eps)
        kernel_inputs.append((scale[:, None] * w).astype(jnp.float32))              # (C_out, C_in)
        kernel_inputs.append((beta - mean * scale).reshape(-1, 1).astype(jnp.float32))  # (C_out, 1)
    kernel_inputs.append(w_final.astype(jnp.float32))

    C_final = w_final.shape[0]
    grid = (B, pl.cdiv(N, TN))

    in_specs = [pl.BlockSpec((None, C_in, TN), lambda b, n: (b, 0, n))]
    in_specs += [_const_spec(a) for a in kernel_inputs[1:]]
    out_specs = pl.BlockSpec((None, C_final, TN), lambda b, n: (b, 0, n))

    kernel = _make_odm_kernel(len(layer_weights))

    return pl.pallas_call(
        kernel,
        out_shape=jax.ShapeDtypeStruct((B, C_final, N), feat.dtype),
        grid=grid,
        in_specs=in_specs,
        out_specs=out_specs,
        compiler_params=pltpu.CompilerParams(
            dimension_semantics=("parallel", "parallel"),
            vmem_limit_bytes=32 * 1024 * 1024,
        ),
    )(*kernel_inputs)


def _reference_forward(feat, layer_weights, bn_params, w_final, eps=1e-5):
    """Pure-jnp reference replicating the PyTorch forward (eval-mode BN)."""
    B, C_in, N = feat.shape
    h = jnp.transpose(feat, (0, 2, 1)).reshape(B * N, C_in).astype(jnp.float32)
    for w, (gamma, beta, mean, var) in zip(layer_weights, bn_params):
        h = h @ w.T
        h = (h - mean) / jnp.sqrt(var + eps) * gamma + beta
        h = jnp.maximum(h, 0.0)
    h = jax.nn.sigmoid(h @ w_final.T)
    return jnp.transpose(h.reshape(B, N, -1), (0, 2, 1))


if __name__ == "__main__":
    # Module config (small, consistent with OdmHead(in_channel, out_channel_final, mlp)).
    # N chosen so it is NOT a multiple of 128 and spans several tiles, exercising both
    # the partial-final-block path and the multi-step 2-D pipelined grid.
    B, N = 2, 200
    in_channel = 4
    mlp = [32, 16]
    out_channel_final = 3

    key = jax.random.PRNGKey(0)
    keys = jax.random.split(key, 2 + 5 * len(mlp))

    feat = jax.random.normal(keys[0], (B, in_channel, N), dtype=jnp.float32)

    layer_weights = []
    bn_params = []
    last_c = in_channel
    ki = 1
    for out_c in mlp:
        w = 0.1 * jax.random.normal(keys[ki], (out_c, last_c), dtype=jnp.float32); ki += 1
        gamma = 1.0 + 0.05 * jax.random.normal(keys[ki], (out_c,), dtype=jnp.float32); ki += 1
        beta = 0.05 * jax.random.normal(keys[ki], (out_c,), dtype=jnp.float32); ki += 1
        mean = 0.01 * jax.random.normal(keys[ki], (out_c,), dtype=jnp.float32); ki += 1
        var = jnp.abs(1.0 + 0.05 * jax.random.normal(keys[ki], (out_c,), dtype=jnp.float32)); ki += 1
        layer_weights.append(w)
        bn_params.append((gamma, beta, mean, var))
        last_c = out_c
    w_final = 0.1 * jax.random.normal(keys[ki], (out_channel_final, last_c), dtype=jnp.float32)

    out = odm_head_forward(feat, layer_weights, bn_params, w_final)
    out = jax.block_until_ready(out)

    ref = _reference_forward(feat, layer_weights, bn_params, w_final)
    assert out.shape == (B, out_channel_final, N)
    assert jnp.allclose(out, ref, atol=1e-5, rtol=1e-5), "mismatch vs jnp reference"

    print("KERNEL_OK")
</pallas_src>

<mosaic_0001>
module attributes {stable_mosaic.version = 11 : i64} {
  func.func @kernel(%arg0: i32, %arg1: i32, %arg2: memref<1x4x128xf32, #tpu.memory_space<vmem>>, %arg3: memref<32x4xf32, #tpu.memory_space<vmem>>, %arg4: memref<32x1xf32, #tpu.memory_space<vmem>>, %arg5: memref<16x32xf32, #tpu.memory_space<vmem>>, %arg6: memref<16x1xf32, #tpu.memory_space<vmem>>, %arg7: memref<3x16xf32, #tpu.memory_space<vmem>>, %arg8: memref<1x3x128xf32, #tpu.memory_space<vmem>>) attributes {dimension_semantics = [#tpu.dimension_semantics<parallel>, #tpu.dimension_semantics<parallel>], iteration_bounds = array<i64: 2, 2>, scalar_prefetch = 0 : i64, scratch_operands = 0 : i64, tpu.core_type = #tpu.core_type<tc>, window_params = [{transform_indices = @transform_0, window_bounds = array<i64: 1, 4, 128>}, {pipeline_mode = #tpu.pipeline_mode<synchronous>, transform_indices = @transform_1, window_bounds = array<i64: 32, 4>}, {pipeline_mode = #tpu.pipeline_mode<synchronous>, transform_indices = @transform_2, window_bounds = array<i64: 32, 1>}, {pipeline_mode = #tpu.pipeline_mode<synchronous>, transform_indices = @transform_3, window_bounds = array<i64: 16, 32>}, {pipeline_mode = #tpu.pipeline_mode<synchronous>, transform_indices = @transform_4, window_bounds = array<i64: 16, 1>}, {pipeline_mode = #tpu.pipeline_mode<synchronous>, transform_indices = @transform_5, window_bounds = array<i64: 3, 16>}, {transform_indices = @transform_6, window_bounds = array<i64: 1, 3, 128>}]} {
    %c0 = arith.constant 0 : index
    %c0_0 = arith.constant 0 : index
    %c0_1 = arith.constant 0 : index
    %0 = vector.load %arg2[%c0, %c0_0, %c0_1] : memref<1x4x128xf32, #tpu.memory_space<vmem>>, vector<1x4x128xf32>
    %1 = vector.shape_cast %0 : vector<1x4x128xf32> to vector<4x128xf32>
    %c0_2 = arith.constant 0 : index
    %c0_3 = arith.constant 0 : index
    %2 = vector.load %arg3[%c0_2, %c0_3] : memref<32x4xf32, #tpu.memory_space<vmem>>, vector<32x4xf32>
    %c0_4 = arith.constant 0 : index
    %c0_5 = arith.constant 0 : index
    %3 = vector.load %arg4[%c0_4, %c0_5] : memref<32x1xf32, #tpu.memory_space<vmem>>, vector<32x1xf32>
    %cst = arith.constant dense<0.000000e+00> : vector<32x128xf32>
    %4 = tpu.matmul %2, %1, %cst {dimension_numbers = #tpu.dot_dimension_numbers<[1], [0], [0], [1], [0, 0, 1, 1], [], []>} : vector<32x4xf32>, vector<4x128xf32>, vector<32x128xf32> -> vector<32x128xf32>
    %5 = vector.broadcast %3 : vector<32x1xf32> to vector<32x128xf32>
    %6 = arith.addf %4, %5 : vector<32x128xf32>
    %cst_6 = arith.constant 0.000000e+00 : f32
    %7 = vector.broadcast %cst_6 : f32 to vector<32x128xf32>
    %8 = arith.maximumf %6, %7 : vector<32x128xf32>
    %c0_7 = arith.constant 0 : index
    %c0_8 = arith.constant 0 : index
    %9 = vector.load %arg5[%c0_7, %c0_8] : memref<16x32xf32, #tpu.memory_space<vmem>>, vector<16x32xf32>
    %c0_9 = arith.constant 0 : index
    %c0_10 = arith.constant 0 : index
    %10 = vector.load %arg6[%c0_9, %c0_10] : memref<16x1xf32, #tpu.memory_space<vmem>>, vector<16x1xf32>
    %cst_11 = arith.constant dense<0.000000e+00> : vector<16x128xf32>
    %11 = tpu.matmul %9, %8, %cst_11 {dimension_numbers = #tpu.dot_dimension_numbers<[1], [0], [0], [1], [0, 0, 1, 1], [], []>} : vector<16x32xf32>, vector<32x128xf32>, vector<16x128xf32> -> vector<16x128xf32>
    %12 = vector.broadcast %10 : vector<16x1xf32> to vector<16x128xf32>
    %13 = arith.addf %11, %12 : vector<16x128xf32>
    %cst_12 = arith.constant 0.000000e+00 : f32
    %14 = vector.broadcast %cst_12 : f32 to vector<16x128xf32>
    %15 = arith.maximumf %13, %14 : vector<16x128xf32>
    %c0_13 = arith.constant 0 : index
    %c0_14 = arith.constant 0 : index
    %16 = vector.load %arg7[%c0_13, %c0_14] : memref<3x16xf32, #tpu.memory_space<vmem>>, vector<3x16xf32>
    %cst_15 = arith.constant dense<0.000000e+00> : vector<3x128xf32>
    %17 = tpu.matmul %16, %15, %cst_15 {dimension_numbers = #tpu.dot_dimension_numbers<[1], [0], [0], [1], [0, 0, 1, 1], [], []>} : vector<3x16xf32>, vector<16x128xf32>, vector<3x128xf32> -> vector<3x128xf32>
    %18 = arith.negf %17 : vector<3x128xf32>
    %19 = math.exp %18 : vector<3x128xf32>
    %cst_16 = arith.constant 1.000000e+00 : f32
    %20 = vector.broadcast %cst_16 : f32 to vector<3x128xf32>
    %21 = arith.addf %20, %19 : vector<3x128xf32>
    %22 = arith.divf %20, %21 : vector<3x128xf32>
    %c0_17 = arith.constant 0 : index
    %c0_18 = arith.constant 0 : index
    %c0_19 = arith.constant 0 : index
    %23 = vector.load %arg8[%c0_17, %c0_18, %c0_19] : memref<1x3x128xf32, #tpu.memory_space<vmem>>, vector<1x3x128xf32>
    %24 = vector.shape_cast %23 : vector<1x3x128xf32> to vector<3x128xf32>
    %25 = vector.shape_cast %22 : vector<3x128xf32> to vector<1x3x128xf32>
    tpu.vector_store %arg8[%c0_17, %c0_18, %c0_19], %25 {strides = array<i32>} : memref<1x3x128xf32, #tpu.memory_space<vmem>>, vector<1x3x128xf32>,
    return
  }
  func.func @transform_0(%arg0: i32, %arg1: i32) -> (i32, i32, i32) {
    %c0_i32 = arith.constant 0 : i32
    %c0_i32_0 = arith.constant 0 : i32
    return %arg0, %c0_i32, %arg1 : i32, i32, i32
  }
  func.func @transform_1(%arg0: i32, %arg1: i32) -> (i32, i32) {
    %c0_i32 = arith.constant 0 : i32
    %c0_i32_0 = arith.constant 0 : i32
    %c0_i32_1 = arith.constant 0 : i32
    return %c0_i32, %c0_i32_0 : i32, i32
  }
  func.func @transform_2(%arg0: i32, %arg1: i32) -> (i32, i32) {
    %c0_i32 = arith.constant 0 : i32
    %c0_i32_0 = arith.constant 0 : i32
    %c0_i32_1 = arith.constant 0 : i32
    return %c0_i32, %c0_i32_0 : i32, i32
  }
  func.func @transform_3(%arg0: i32, %arg1: i32) -> (i32, i32) {
    %c0_i32 = arith.constant 0 : i32
    %c0_i32_0 = arith.constant 0 : i32
    %c0_i32_1 = arith.constant 0 : i32
    return %c0_i32, %c0_i32_0 : i32, i32
  }
  func.func @transform_4(%arg0: i32, %arg1: i32) -> (i32, i32) {
    %c0_i32 = arith.constant 0 : i32
    %c0_i32_0 = arith.constant 0 : i32
    %c0_i32_1 = arith.constant 0 : i32
    return %c0_i32, %c0_i32_0 : i32, i32
  }
  func.func @transform_5(%arg0: i32, %arg1: i32) -> (i32, i32) {
    %c0_i32 = arith.constant 0 : i32
    %c0_i32_0 = arith.constant 0 : i32
    %c0_i32_1 = arith.constant 0 : i32
    return %c0_i32, %c0_i32_0 : i32, i32
  }
  func.func @transform_6(%arg0: i32, %arg1: i32) -> (i32, i32, i32) {
    %c0_i32 = arith.constant 0 : i32
    %c0_i32_0 = arith.constant 0 : i32
    return %arg0, %c0_i32, %arg1 : i32, i32, i32
  }
}

</mosaic_0001>

<bundles_post_ra>
// kernel: tpu_custom_call.1
= control target key start
LH: loop header
LB: loop body
LE: loop exit
PB: predicated region body
PF: predicated region fallthrough
CT: control target
= control target key end

     0   :  { %s871_s21 = smov 0   ;;  %s873_s22 = smov 0   ;;  %s974_s0 = inlined_call_operand.vmem [shape: f32[2,4,200], index: 0, kind: input, shape index: {}]   ;;  %s975_s1 = inlined_call_operand.vmem [shape: f32[32,4], index: 1, kind: input, shape index: {}]   ;;  %s976_s2 = inlined_call_operand.vmem [shape: f32[32,1], index: 2, kind: input, shape index: {}]   ;;  %s977_s3 = inlined_call_operand.vmem [shape: f32[16,32], index: 3, kind: input, shape index: {}]   ;;  %s978_s4 = inlined_call_operand.vmem [shape: f32[16,1], index: 4, kind: input, shape index: {}]   ;;  %s979_s5 = inlined_call_operand.vmem [shape: f32[3,16], index: 5, kind: input, shape index: {}]   ;;  %s980_s6 = inlined_call_operand.vmem [shape: f32[2,3,200], index: 6, kind: output, shape index: {}]  }
   0x1   :  { %s875_s23 = smov 0   ;;  %s877_s24 = smov 0  }
   0x2   :  { %s879_s25 = smov 0  }
   0x3 LB: > { %s25_s26 = sadd.s32 1, %s823_s23  ;;  %s28_s27 = sadd.s32 1, %s827_s24  ;;  %s831_s25 = sphi %s879_s25, %s16_s25   ;;  %s827_s24 = sphi %s877_s24, %s984_s24   ;;  %s823_s23 = sphi %s875_s23, %s983_s23   ;;  %s819_s22 = sphi %s873_s22, %s982_s22   ;;  %s815_s21 = sphi %s871_s21, %s981_s21  }
   0x4   : > { %p26_p0 = scmp.ge.s32.totalorder %s25_s26, 2  ;;  %p688_p1 = scmp.ge.s32.totalorder %s831_s25, 1 }
   0x5   : > { %p231_p2 = scmp.lt.s32.totalorder %s831_s25, 5 }
   0x6   : > { %s986_s26 = smov (%p26_p0, %s25_s26), 0  ;;  %s988_s27 = smov (!%p26_p0, %s28_s27), %s827_s24 }
   0x7   : > { %p232_p3 = pnand %p688_p1, %p231_p2  ;;  %p30_p4 = scmp.ge.s32.totalorder %s988_s27, 2 }
   0x8   : > { %p267_p5 = scmp.lt.s32.totalorder (!%p232_p3), %s819_s22, 1  ;;  %p269_p6 = scmp.lt.s32.totalorder (!%p232_p3), %s815_s21, 1 }
   0x9   : > { %s990_s27 = smov (%p30_p4, %s988_s27), 0  ;;  %235 = sbr.rel (%p232_p3) target bundleno = 657 (0x291), region = 44 }
   0xe   : > { %v284_v0 = vld [vmem:[%s975_s1] sm:$0xff]  ;;  %vm312_vm0 = vcmask 31744   ;;  %v291_v1 = vld [vmem:[%s976_s2 + $0x18] sm:$0xff]  ;;  %s992_s22 = smov (!%p267_p5, %s819_s22), 1  ;;  %v833_v2 = vmov 0   ;;  %v289_v3 = vld [vmem:[%s976_s2 + $0x8] sm:$0xff] }
   0xf   : > { %720 = vmatprep.mubr.msk.f32.mxu0 %vm312_vm0, %v284_v0  ;;  %787 = vset.pattern.permute.xlu0 %v833_v2  ;;  %s994_s21 = smov (!%p269_p6, %s815_s21), 1  ;;  %s689_s10 = sshll.u32 %s992_s22, 1  ;;  %v290_v4 = vld [vmem:[%s976_s2 + $0x10] sm:$0xff]  ;;  %v288_v5 = vld [vmem:[%s976_s2] sm:$0xff]  ;;  %vm325_vm1 = vcmask 1043456   ;;  %v285_v7 = vld [vmem:[%s975_s1 + $0x8] sm:$0xff] }
  0x10   : > { %788 = vset.pattern.permute.xlu1 %v833_v2  ;;  %309 = vperm.xlu0 %787, %v291_v1   ;;  %s917_s15 = sadd.s32 %s689_s10, %s994_s21  ;;  %v421_v8 = vld [vmem:[%s978_s4 + $0x8] sm:$0xff]  ;;  %v286_v9 = vld [vmem:[%s975_s1 + $0x10] sm:$0xff]  ;;  %v420_v10 = vld [vmem:[%s978_s4] sm:$0xff]  ;;  %vm432_vm2 = vcmask 261120   ;;  %v834_v30 = vmov 0.0   ;;  %vm835_vm3 = vmmov 0  }
  0x11   : > { %299 = vperm.xlu1 %788, %v289_v3   ;;  %s690_s16 = sshll.u32 %s917_s15, 2  ;;  %v287_v11 = vld [vmem:[%s975_s1 + $0x18] sm:$0xff]  ;;  %v418_v12 = vld [vmem:[%s977_s3] sm:$0xff]  ;;  %v419_v29 = vld [vmem:[%s977_s3 + $0x8] sm:$0xff]  ;;  %vm517_vm4 = vcmask 130048  }
  0x12   : > { %s274_s19 = scalar_lea.vmem %s974_s0, %s690_s16  ;;  %734 = vmatprep.mubr.msk.f32.mxu1 %vm432_vm2, %v418_v12  ;;  %v516_v39 = vld [vmem:[%s979_s5] sm:$0x7]  ;;  %s282_s22 = scalar_lea.vmem %s980_s6, %s690_s16 }
  0x13   : > { %v283_v6 = vld [vmem:[%s274_s19] sm:$0xf] }
  0x14   : > { %304 = vperm.xlu0 %787, %v290_v4   ;;  %718 = vmatprep.subr.msk.mxu0 %vm325_vm1, %v283_v6 }
  0x15   : > { %294 = vperm.xlu1 %788, %v288_v5   ;;  %719 = vmatpush3.msk.msra.mxu0 %vm325_vm1, %v283_v6 }
  0x16   : > { %721 = vmatmul.mubr.msk.f32.vlgmr.msra.gmra.mxu0 %vm312_vm0, %v285_v7  ;;  %737 = vmatprep.subr.mxu0 %v834_v30 }
  0x17   : > { %723 = vmatprep.mubr.msk.f32.mxu0 %vm312_vm0, %v286_v9 }
  0x18   : > { %429 = vperm.xlu0 %787, %v421_v8  }
  0x19   : > { %424 = vperm.xlu1 %788, %v420_v10  }
  0x1a   : > { %724 = vmatmul.mubr.msk.f32.gmra.mxu0 %vm312_vm0, %v287_v11 }
  0x1b   : > { %741 = vmatprep.mubr.msk.f32.mxu0 %vm835_vm3, %v834_v30 }
  0x8b   : > { %v310_v13 = vpop.permute.xlu0 %309 }
  0x8c   : > { %v300_v14 = vpop.permute.xlu1 %299 }
  0x8f   : > { %v305_v18 = vpop.permute.xlu0 %304 }
  0x90   : > { %v295_v20 = vpop.permute.xlu1 %294 }
  0x93   : > { %v430_v31 = vpop.permute.xlu0 %429 }
  0x94   : > { %v425_v34 = vpop.permute.xlu1 %424 }
  0xd6   : > { %v722_v15 = vpop.f32.mrf.mxu0 }
  0xd7   : > { %v401_v22 = vadd.f32 %v722_v15, %v300_v14 }
  0xd8   : > { %v395_v16 = vpop.f32.mrf.mxu0 }
  0xd9   : > { %v396_v25 = vadd.f32 %v395_v16, %v295_v20  ;;  %v415_v27 = vmax.f32 %v401_v22, 0.0 }
  0xda   : > { %v725_v17 = vpop.f32.mrf.mxu0 }
  0xdb   : > { %v411_v19 = vadd.f32 %v725_v17, %v310_v13  ;;  %v414_v28 = vmax.f32 %v396_v25, 0.0 }
  0xdc   : > { %v405_v21 = vpop.f32.mrf.mxu0 }
  0xdd   : > { %v417_v23 = vmax.f32 %v411_v19, 0.0  ;;  %v406_v24 = vadd.f32 %v405_v21, %v305_v18 }
  0xdf   : > { %v416_v26 = vmax.f32 %v406_v24, 0.0  ;;  %726 = vmatprep.subr.mxu1 %v417_v23 }
  0xe0   : > { %727 = vmatpush3.msra.mxu1 %v417_v23 }
  0xe1   : > { %728 = vmatprep.subr.mxu1 %v416_v26 }
  0xe2   : > { %729 = vmatpush3.msra.mxu1 %v416_v26 }
  0xe3   : > { %730 = vmatprep.subr.mxu1 %v415_v27 }
  0xe4   : > { %731 = vmatpush3.msra.mxu1 %v415_v27 }
  0xe5   : > { %732 = vmatprep.subr.mxu1 %v414_v28 }
  0xe6   : > { %733 = vmatpush3.msra.mxu1 %v414_v28 }
  0xe7   : > { %735 = vmatmul.mubr.msk.f32.vlgmr.msra.gmra.mxu1 %vm432_vm2, %v419_v29 }
 0x1a7   : > { %v736_v32 = vpop.f32.mrf.mxu1 }
 0x1a8   : > { %v511_v33 = vadd.f32 %v736_v32, %v430_v31 }
 0x1a9   : > { %v505_v35 = vpop.f32.mrf.mxu1 }
 0x1aa   : > { %v515_v36 = vmax.f32 %v511_v33, 0.0  ;;  %v506_v37 = vadd.f32 %v505_v35, %v425_v34 }
 0x1ac   : > { %v514_v38 = vmax.f32 %v506_v37, 0.0  ;;  %738 = vmatpush3.msra.mxu0 %v515_v36 }
 0x1ad   : > { %739 = vmatprep.subr.mxu0 %v834_v30 }
 0x1ae   : > { %740 = vmatpush3.msra.mxu0 %v514_v38 }
 0x1af   : > { %742 = vmatmul.mubr.msk.f32.vlgmr.msra.gmra.mxu0 %vm517_vm4, %v516_v39 }
 0x26f   : > { %v587_v40 = vpop.f32.mrf.mxu0 }
 0x270   : > { %v701_v41 = vmul.f32 -1.442695, %v587_v40 }
 0x271   : > { %v743_v42 = vpop.f32.mrf.mxu0 }
 0x272   : > { %789 = vpow2.f32 %v701_v41 }
 0x27f   : > { %v790_v43 = vpop.eup %789 }
 0x280   : > { %v594_v44 = vadd.f32 1.0, %v790_v43 }
 0x282   : > { %791 = vrcp.f32 %v594_v44 }
 0x28f   : > { %v792_v45 = vpop.eup %791 }
 0x290   : > { %597 = vst [vmem:[%s282_s22] sm:$0x7] %v792_v45 }
 0x291 PF: > { %s16_s25 = sadd.s32 1, %s831_s25   ;;  %s981_s21 = smov %s823_s23 }
 0x292   : > { %p13_p7 = scmp.ge.s32.totalorder %s16_s25, 6   ;;  %s982_s22 = smov %s827_s24 }
 0x293   : > { %s983_s23 = smov %s986_s26  ;;  %s984_s24 = smov %s990_s27 }
 0x294   :  { %15 = sbr.rel (!%p13_p7) target bundleno = 3 (0x3), region = 74 }

</bundles_post_ra>
